<compile_context>
chip_gen: v5e
topology: v5e:2x2
jax: 0.10.0
libtpu: 0.0.40
codegen_flags: <defaults>
</compile_context>

<pallas_src>
import functools

import jax
import jax.numpy as jnp
from jax.experimental import pallas as pl
from jax.experimental.pallas import tpu as pltpu


# ------------------------------ kernel --------------------------------------

def _dqn_kernel(state_ref, w0_ref, b0_ref, w1_ref, b1_ref,
                wq_mu_ref, wq_sg_ref, wq_ns_ref,
                bq_mu_ref, bq_sg_ref, bq_ns_ref,
                out_ref, *, layer_size):
    """One batch tile of the full MLP forward.

    state_ref: (TB, obs_pad)  activations (weight dtype, e.g. bf16)
    w*_ref:    padded weights in (in, out) layout, resident in VMEM across
               grid steps (constant index_map).
    b*_ref:    (1, out_pad) float32 biases.
    """
    wdt = w0_ref.dtype

    # First linear: obs_pad -> hid_pad.  f32 accumulation, f32 bias add.
    h = jnp.dot(state_ref[...].astype(wdt), w0_ref[...],
                preferred_element_type=jnp.float32) + b0_ref[...]

    # Hoist the shared-block operands out of the loop (loaded once per tile).
    w1 = w1_ref[...]
    b1 = b1_ref[...]

    def block(_, h):
        # ReLU + bias stay in f32; cast only the MXU operand.
        a = jnp.maximum(h, 0.0).astype(wdt)
        return jnp.dot(a, w1, preferred_element_type=jnp.float32) + b1

    h = jax.lax.fori_loop(0, layer_size - 1, block, h, unroll=True)

    # NoisyLinear effective weight/bias built in-kernel (VPU work rides under
    # the MXU/DMA) -- no HBM materialization of the effective head weight.
    wq = wq_mu_ref[...] + wq_sg_ref[...] * wq_ns_ref[...]
    bq = bq_mu_ref[...] + bq_sg_ref[...] * bq_ns_ref[...]

    q = jnp.dot(h.astype(wdt), wq, preferred_element_type=jnp.float32) + bq
    out_ref[...] = q.astype(out_ref.dtype)


# ------------------------------ wrapper -------------------------------------

def _round_up(x, m):
    return ((x + m - 1) // m) * m


def dqn_policy_forward(state, params, dims, *, layer_size, batch_tile=256):
    """state: (B, obs_dim) float32.  params/dims from make_dqn_params."""
    B = state.shape[0]
    obs_dim = dims["obs_dim"]
    action_dim = dims["action_dim"]
    obs_pad, hid_pad, act_pad = dims["obs_pad"], dims["hid_pad"], dims["act_pad"]
    wdt = params["w0"].dtype

    # Batch tile: multiple of 8 sublanes; batch padded up to a tile multiple.
    TB = min(batch_tile, _round_up(max(B, 1), 8))
    B_pad = _round_up(B, TB)
    grid = (B_pad // TB,)

    # Pad + cast the streamed activation once in the wrapper (single fused op).
    x = jnp.pad(state, ((0, B_pad - B), (0, obs_pad - state.shape[1]))).astype(wdt)

    tiled = lambda shape: pl.BlockSpec(shape, lambda i: (i, 0))
    resident = lambda shape: pl.BlockSpec(shape, lambda i: (0, 0))  # stays in VMEM

    flops = 2 * B_pad * (obs_pad * hid_pad
                         + (layer_size - 1) * hid_pad * hid_pad
                         + hid_pad * act_pad)
    bytes_accessed = (x.size * x.dtype.itemsize
                      + sum(int(v.size) * v.dtype.itemsize for v in params.values())
                      + B_pad * act_pad * 4)

    kernel = functools.partial(_dqn_kernel, layer_size=layer_size)
    out = pl.pallas_call(
        kernel,
        out_shape=jax.ShapeDtypeStruct((B_pad, act_pad), jnp.float32),
        grid=grid,
        in_specs=[
            tiled((TB, obs_pad)),
            resident((obs_pad, hid_pad)), resident((1, hid_pad)),
            resident((hid_pad, hid_pad)), resident((1, hid_pad)),
            resident((hid_pad, act_pad)), resident((hid_pad, act_pad)),
            resident((hid_pad, act_pad)),
            resident((1, act_pad)), resident((1, act_pad)), resident((1, act_pad)),
        ],
        out_specs=tiled((TB, act_pad)),
        compiler_params=pltpu.CompilerParams(
            dimension_semantics=("parallel",)),
        cost_estimate=pl.CostEstimate(
            flops=int(flops), transcendentals=0,
            bytes_accessed=int(bytes_accessed)),
    )(x, params["w0"], params["b0"], params["w1"], params["b1"],
      params["wq_mu"], params["wq_sigma"], params["wq_noise"],
      params["bq_mu"], params["bq_sigma"], params["bq_noise"])

    # Lane-dense padded output -> slice back to logical shape.
    return out[:B, :action_dim]


# ----------------------- deterministic parameter init -----------------------

def _linear_init(key, in_dim, out_dim):
    """nn.Linear default init: U(-1/sqrt(in), 1/sqrt(in)) for W and b."""
    kw, kb = jax.random.split(key)
    bound = 1.0 / jnp.sqrt(in_dim)
    w = jax.random.uniform(kw, (in_dim, out_dim), jnp.float32, -bound, bound)
    b = jax.random.uniform(kb, (1, out_dim), jnp.float32, -bound, bound)
    return w, b


def _noisy_linear_params(key, in_dim, out_dim, sigma_init=0.4):
    """NoisyLinearNet parameters + factorized noise (training-mode path),
    returned in the kernel's (in, out) layout."""
    k_mu_w, k_mu_b, k_eps_i, k_eps_j = jax.random.split(key, 4)
    mu_range = jnp.sqrt(3.0 / in_dim)
    w_mu = jax.random.uniform(k_mu_w, (out_dim, in_dim), jnp.float32,
                              -mu_range, mu_range)
    b_mu = jax.random.uniform(k_mu_b, (out_dim,), jnp.float32,
                              -mu_range, mu_range)
    w_sigma = jnp.full((out_dim, in_dim), sigma_init / jnp.sqrt(in_dim),
                       jnp.float32)
    b_sigma = jnp.full((out_dim,), sigma_init / jnp.sqrt(out_dim), jnp.float32)

    def f(x):  # sign(x) * sqrt(|x|)
        return jnp.sign(x) * jnp.sqrt(jnp.abs(x))

    eps_i = f(jax.random.normal(k_eps_i, (in_dim,), jnp.float32))
    eps_j = f(jax.random.normal(k_eps_j, (out_dim,), jnp.float32))
    w_noise = jnp.outer(eps_j, eps_i)            # torch.ger(eps_j, eps_i)
    b_noise = eps_j
    return (w_mu.T, w_sigma.T, w_noise.T,
            b_mu[None, :], b_sigma[None, :], b_noise[None, :])


def _pad2d(a, rows, cols):
    return jnp.pad(a, ((0, rows - a.shape[0]), (0, cols - a.shape[1])))


def make_dqn_params(key, obs_dim, action_dim, hidden_size, *, use_noisy=True,
                    sigma_init=0.4, weight_dtype=jnp.bfloat16):
    """Build parameters padded to 128-lane multiples (done once, not per call).

    Weights are stored in `weight_dtype` (bf16 halves HBM bytes and hits the
    bf16 MXU path); biases stay f32.  Padded regions are zero so the logical
    forward is unchanged.
    """
    k0, k1, kq = jax.random.split(key, 3)
    w0, b0 = _linear_init(k0, obs_dim, hidden_size)
    w1, b1 = _linear_init(k1, hidden_size, hidden_size)
    if use_noisy:
        (wq_mu, wq_sigma, wq_noise,
         bq_mu, bq_sigma, bq_noise) = _noisy_linear_params(
             kq, hidden_size, action_dim, sigma_init)
    else:
        wq_mu, bq_mu = _linear_init(kq, hidden_size, action_dim)
        wq_sigma = jnp.zeros_like(wq_mu)
        wq_noise = jnp.zeros_like(wq_mu)
        bq_sigma = jnp.zeros_like(bq_mu)
        bq_noise = jnp.zeros_like(bq_mu)

    obs_pad = _round_up(obs_dim, 128)
    hid_pad = _round_up(hidden_size, 128)
    act_pad = _round_up(action_dim, 128)

    params = dict(
        w0=_pad2d(w0, obs_pad, hid_pad).astype(weight_dtype),
        b0=_pad2d(b0, 1, hid_pad),
        w1=_pad2d(w1, hid_pad, hid_pad).astype(weight_dtype),
        b1=_pad2d(b1, 1, hid_pad),
        wq_mu=_pad2d(wq_mu, hid_pad, act_pad).astype(weight_dtype),
        wq_sigma=_pad2d(wq_sigma, hid_pad, act_pad).astype(weight_dtype),
        wq_noise=_pad2d(wq_noise, hid_pad, act_pad).astype(weight_dtype),
        bq_mu=_pad2d(bq_mu, 1, act_pad),
        bq_sigma=_pad2d(bq_sigma, 1, act_pad),
        bq_noise=_pad2d(bq_noise, 1, act_pad),
    )
    dims = dict(obs_dim=obs_dim, action_dim=action_dim, hidden_size=hidden_size,
                obs_pad=obs_pad, hid_pad=hid_pad, act_pad=act_pad)
    return params, dims


# ------------------------------ demo / test ----------------------------------

if __name__ == "__main__":
    # Small, module-consistent shapes.  NOTE: at these shapes the kernel is
    # pure launch overhead -- the design pays off at large batch (the batch
    # grid axis tiles TB=256 rows per step and shards across TCs on v7x).
    batch = 2
    obs_dim = 16
    action_dim = 4
    hidden_size = 32
    layer_size = 3          # Linear + 2x [ReLU, shared Linear(hidden, hidden)]
    use_noisy = True

    key = jax.random.PRNGKey(0)
    k_state, k_params = jax.random.split(key)
    state = jax.random.normal(k_state, (batch, obs_dim), jnp.float32)
    params, dims = make_dqn_params(k_params, obs_dim, action_dim, hidden_size,
                                   use_noisy=use_noisy,
                                   weight_dtype=jnp.bfloat16)

    q = dqn_policy_forward(state, params, dims, layer_size=layer_size)
    q = jax.block_until_ready(q)

    # Pure-JAX reference mirroring the kernel's arithmetic exactly
    # (same padding, same bf16 operands, f32 accumulation).
    def ref_forward(s, p):
        wdt = p["w0"].dtype
        x = jnp.pad(s, ((0, 0), (0, dims["obs_pad"] - s.shape[1]))).astype(wdt)
        h = jnp.dot(x, p["w0"], preferred_element_type=jnp.float32) + p["b0"]
        for _ in range(layer_size - 1):
            h = jnp.dot(jnp.maximum(h, 0.0).astype(wdt), p["w1"],
                        preferred_element_type=jnp.float32) + p["b1"]
        wq = p["wq_mu"] + p["wq_sigma"] * p["wq_noise"]
        bq = p["bq_mu"] + p["bq_sigma"] * p["bq_noise"]
        out = jnp.dot(h.astype(wdt), wq,
                      preferred_element_type=jnp.float32) + bq
        return out[:, :action_dim]

    ref = ref_forward(state, params)
    assert q.shape == (batch, action_dim)
    assert jnp.allclose(q, ref, atol=2e-3, rtol=2e-3), "mismatch vs reference"

    print("KERNEL_OK")
</pallas_src>

<mosaic_0001>
module attributes {stable_mosaic.version = 11 : i64} {
  func.func @_dqn_kernel(%arg0: i32, %arg1: memref<8x128xbf16, #tpu.memory_space<vmem>>, %arg2: memref<128x128xbf16, #tpu.memory_space<vmem>>, %arg3: memref<1x128xf32, #tpu.memory_space<vmem>>, %arg4: memref<128x128xbf16, #tpu.memory_space<vmem>>, %arg5: memref<1x128xf32, #tpu.memory_space<vmem>>, %arg6: memref<128x128xbf16, #tpu.memory_space<vmem>>, %arg7: memref<128x128xbf16, #tpu.memory_space<vmem>>, %arg8: memref<128x128xbf16, #tpu.memory_space<vmem>>, %arg9: memref<1x128xf32, #tpu.memory_space<vmem>>, %arg10: memref<1x128xf32, #tpu.memory_space<vmem>>, %arg11: memref<1x128xf32, #tpu.memory_space<vmem>>, %arg12: memref<8x128xf32, #tpu.memory_space<vmem>>) attributes {dimension_semantics = [#tpu.dimension_semantics<parallel>], iteration_bounds = array<i64: 1>, scalar_prefetch = 0 : i64, scratch_operands = 0 : i64, tpu.core_type = #tpu.core_type<tc>, window_params = [{transform_indices = @transform_0, window_bounds = array<i64: 8, 128>}, {pipeline_mode = #tpu.pipeline_mode<synchronous>, transform_indices = @transform_1, window_bounds = array<i64: 128, 128>}, {pipeline_mode = #tpu.pipeline_mode<synchronous>, transform_indices = @transform_2, window_bounds = array<i64: 1, 128>}, {pipeline_mode = #tpu.pipeline_mode<synchronous>, transform_indices = @transform_3, window_bounds = array<i64: 128, 128>}, {pipeline_mode = #tpu.pipeline_mode<synchronous>, transform_indices = @transform_4, window_bounds = array<i64: 1, 128>}, {pipeline_mode = #tpu.pipeline_mode<synchronous>, transform_indices = @transform_5, window_bounds = array<i64: 128, 128>}, {pipeline_mode = #tpu.pipeline_mode<synchronous>, transform_indices = @transform_6, window_bounds = array<i64: 128, 128>}, {pipeline_mode = #tpu.pipeline_mode<synchronous>, transform_indices = @transform_7, window_bounds = array<i64: 128, 128>}, {pipeline_mode = #tpu.pipeline_mode<synchronous>, transform_indices = @transform_8, window_bounds = array<i64: 1, 128>}, {pipeline_mode = #tpu.pipeline_mode<synchronous>, transform_indices = @transform_9, window_bounds = array<i64: 1, 128>}, {pipeline_mode = #tpu.pipeline_mode<synchronous>, transform_indices = @transform_10, window_bounds = array<i64: 1, 128>}, {transform_indices = @transform_11, window_bounds = array<i64: 8, 128>}]} {
    %c0 = arith.constant 0 : index
    %c0_0 = arith.constant 0 : index
    %0 = vector.load %arg1[%c0, %c0_0] : memref<8x128xbf16, #tpu.memory_space<vmem>>, vector<8x128xbf16>
    %c0_1 = arith.constant 0 : index
    %c0_2 = arith.constant 0 : index
    %1 = vector.load %arg2[%c0_1, %c0_2] : memref<128x128xbf16, #tpu.memory_space<vmem>>, vector<128x128xbf16>
    %cst = arith.constant dense<0.000000e+00> : vector<8x128xf32>
    %2 = tpu.matmul %0, %1, %cst {dimension_numbers = #tpu.dot_dimension_numbers<[1], [0], [0], [1], [0, 0, 1, 1], [], []>} : vector<8x128xbf16>, vector<128x128xbf16>, vector<8x128xf32> -> vector<8x128xf32>
    %c0_3 = arith.constant 0 : index
    %c0_4 = arith.constant 0 : index
    %3 = vector.load %arg3[%c0_3, %c0_4] : memref<1x128xf32, #tpu.memory_space<vmem>>, vector<1x128xf32>
    %4 = vector.broadcast %3 : vector<1x128xf32> to vector<8x128xf32>
    %5 = arith.addf %2, %4 : vector<8x128xf32>
    %c0_5 = arith.constant 0 : index
    %c0_6 = arith.constant 0 : index
    %6 = vector.load %arg4[%c0_5, %c0_6] : memref<128x128xbf16, #tpu.memory_space<vmem>>, vector<128x128xbf16>
    %c0_7 = arith.constant 0 : index
    %c0_8 = arith.constant 0 : index
    %7 = vector.load %arg5[%c0_7, %c0_8] : memref<1x128xf32, #tpu.memory_space<vmem>>, vector<1x128xf32>
    %c0_i32 = arith.constant 0 : i32
    %cst_9 = arith.constant 0.000000e+00 : f32
    %8 = vector.broadcast %cst_9 : f32 to vector<8x128xf32>
    %9 = arith.maximumf %5, %8 : vector<8x128xf32>
    %10 = arith.truncf %9 : vector<8x128xf32> to vector<8x128xbf16>
    %cst_10 = arith.constant dense<0.000000e+00> : vector<8x128xf32>
    %11 = tpu.matmul %10, %6, %cst_10 {dimension_numbers = #tpu.dot_dimension_numbers<[1], [0], [0], [1], [0, 0, 1, 1], [], []>} : vector<8x128xbf16>, vector<128x128xbf16>, vector<8x128xf32> -> vector<8x128xf32>
    %12 = vector.broadcast %7 : vector<1x128xf32> to vector<8x128xf32>
    %13 = arith.addf %11, %12 : vector<8x128xf32>
    %c1_i32 = arith.constant 1 : i32
    %cst_11 = arith.constant 0.000000e+00 : f32
    %14 = vector.broadcast %cst_11 : f32 to vector<8x128xf32>
    %15 = arith.maximumf %13, %14 : vector<8x128xf32>
    %16 = arith.truncf %15 : vector<8x128xf32> to vector<8x128xbf16>
    %cst_12 = arith.constant dense<0.000000e+00> : vector<8x128xf32>
    %17 = tpu.matmul %16, %6, %cst_12 {dimension_numbers = #tpu.dot_dimension_numbers<[1], [0], [0], [1], [0, 0, 1, 1], [], []>} : vector<8x128xbf16>, vector<128x128xbf16>, vector<8x128xf32> -> vector<8x128xf32>
    %18 = vector.broadcast %7 : vector<1x128xf32> to vector<8x128xf32>
    %19 = arith.addf %17, %18 : vector<8x128xf32>
    %c0_13 = arith.constant 0 : index
    %c0_14 = arith.constant 0 : index
    %20 = vector.load %arg6[%c0_13, %c0_14] : memref<128x128xbf16, #tpu.memory_space<vmem>>, vector<128x128xbf16>
    %c0_15 = arith.constant 0 : index
    %c0_16 = arith.constant 0 : index
    %21 = vector.load %arg7[%c0_15, %c0_16] : memref<128x128xbf16, #tpu.memory_space<vmem>>, vector<128x128xbf16>
    %c0_17 = arith.constant 0 : index
    %c0_18 = arith.constant 0 : index
    %22 = vector.load %arg8[%c0_17, %c0_18] : memref<128x128xbf16, #tpu.memory_space<vmem>>, vector<128x128xbf16>
    %23 = arith.mulf %21, %22 : vector<128x128xbf16>
    %24 = arith.addf %20, %23 : vector<128x128xbf16>
    %c0_19 = arith.constant 0 : index
    %c0_20 = arith.constant 0 : index
    %25 = vector.load %arg9[%c0_19, %c0_20] : memref<1x128xf32, #tpu.memory_space<vmem>>, vector<1x128xf32>
    %c0_21 = arith.constant 0 : index
    %c0_22 = arith.constant 0 : index
    %26 = vector.load %arg10[%c0_21, %c0_22] : memref<1x128xf32, #tpu.memory_space<vmem>>, vector<1x128xf32>
    %c0_23 = arith.constant 0 : index
    %c0_24 = arith.constant 0 : index
    %27 = vector.load %arg11[%c0_23, %c0_24] : memref<1x128xf32, #tpu.memory_space<vmem>>, vector<1x128xf32>
    %28 = arith.mulf %26, %27 : vector<1x128xf32>
    %29 = arith.addf %25, %28 : vector<1x128xf32>
    %30 = arith.truncf %19 : vector<8x128xf32> to vector<8x128xbf16>
    %cst_25 = arith.constant dense<0.000000e+00> : vector<8x128xf32>
    %31 = tpu.matmul %30, %24, %cst_25 {dimension_numbers = #tpu.dot_dimension_numbers<[1], [0], [0], [1], [0, 0, 1, 1], [], []>} : vector<8x128xbf16>, vector<128x128xbf16>, vector<8x128xf32> -> vector<8x128xf32>
    %32 = vector.broadcast %29 : vector<1x128xf32> to vector<8x128xf32>
    %33 = arith.addf %31, %32 : vector<8x128xf32>
    %c0_26 = arith.constant 0 : index
    %c0_27 = arith.constant 0 : index
    %34 = vector.load %arg12[%c0_26, %c0_27] : memref<8x128xf32, #tpu.memory_space<vmem>>, vector<8x128xf32>
    tpu.vector_store %arg12[%c0_26, %c0_27], %33 {strides = array<i32>} : memref<8x128xf32, #tpu.memory_space<vmem>>, vector<8x128xf32>,
    return
  }
  func.func @transform_0(%arg0: i32) -> (i32, i32) {
    %c0_i32 = arith.constant 0 : i32
    %c0_i32_0 = arith.constant 0 : i32
    return %arg0, %c0_i32 : i32, i32
  }
  func.func @transform_1(%arg0: i32) -> (i32, i32) {
    %c0_i32 = arith.constant 0 : i32
    %c0_i32_0 = arith.constant 0 : i32
    %c0_i32_1 = arith.constant 0 : i32
    return %c0_i32, %c0_i32_0 : i32, i32
  }
  func.func @transform_2(%arg0: i32) -> (i32, i32) {
    %c0_i32 = arith.constant 0 : i32
    %c0_i32_0 = arith.constant 0 : i32
    %c0_i32_1 = arith.constant 0 : i32
    return %c0_i32, %c0_i32_0 : i32, i32
  }
  func.func @transform_3(%arg0: i32) -> (i32, i32) {
    %c0_i32 = arith.constant 0 : i32
    %c0_i32_0 = arith.constant 0 : i32
    %c0_i32_1 = arith.constant 0 : i32
    return %c0_i32, %c0_i32_0 : i32, i32
  }
  func.func @transform_4(%arg0: i32) -> (i32, i32) {
    %c0_i32 = arith.constant 0 : i32
    %c0_i32_0 = arith.constant 0 : i32
    %c0_i32_1 = arith.constant 0 : i32
    return %c0_i32, %c0_i32_0 : i32, i32
  }
  func.func @transform_5(%arg0: i32) -> (i32, i32) {
    %c0_i32 = arith.constant 0 : i32
    %c0_i32_0 = arith.constant 0 : i32
    %c0_i32_1 = arith.constant 0 : i32
    return %c0_i32, %c0_i32_0 : i32, i32
  }
  func.func @transform_6(%arg0: i32) -> (i32, i32) {
    %c0_i32 = arith.constant 0 : i32
    %c0_i32_0 = arith.constant 0 : i32
    %c0_i32_1 = arith.constant 0 : i32
    return %c0_i32, %c0_i32_0 : i32, i32
  }
  func.func @transform_7(%arg0: i32) -> (i32, i32) {
    %c0_i32 = arith.constant 0 : i32
    %c0_i32_0 = arith.constant 0 : i32
    %c0_i32_1 = arith.constant 0 : i32
    return %c0_i32, %c0_i32_0 : i32, i32
  }
  func.func @transform_8(%arg0: i32) -> (i32, i32) {
    %c0_i32 = arith.constant 0 : i32
    %c0_i32_0 = arith.constant 0 : i32
    %c0_i32_1 = arith.constant 0 : i32
    return %c0_i32, %c0_i32_0 : i32, i32
  }
  func.func @transform_9(%arg0: i32) -> (i32, i32) {
    %c0_i32 = arith.constant 0 : i32
    %c0_i32_0 = arith.constant 0 : i32
    %c0_i32_1 = arith.constant 0 : i32
    return %c0_i32, %c0_i32_0 : i32, i32
  }
  func.func @transform_10(%arg0: i32) -> (i32, i32) {
    %c0_i32 = arith.constant 0 : i32
    %c0_i32_0 = arith.constant 0 : i32
    %c0_i32_1 = arith.constant 0 : i32
    return %c0_i32, %c0_i32_0 : i32, i32
  }
  func.func @transform_11(%arg0: i32) -> (i32, i32) {
    %c0_i32 = arith.constant 0 : i32
    %c0_i32_0 = arith.constant 0 : i32
    return %arg0, %c0_i32 : i32, i32
  }
}

</mosaic_0001>

<bundles_post_ra>
// kernel: tpu_custom_call.1
= control target key start
LH: loop header
LB: loop body
LE: loop exit
PB: predicated region body
PF: predicated region fallthrough
CT: control target
= control target key end

     0   :  { %16 = vsyncpa [#allocation3], 0  ;;  %s1028_s0 = inlined_call_operand.hbm [shape: bf16[8,128], index: 0, kind: input, shape index: {}]   ;;  %s1029_s1 = inlined_call_operand.hbm [shape: bf16[128,128], index: 1, kind: input, shape index: {}]   ;;  %s1030_s2 = inlined_call_operand.vmem [shape: f32[1,128], index: 2, kind: input, shape index: {}]   ;;  %s1031_s3 = inlined_call_operand.hbm [shape: bf16[128,128], index: 3, kind: input, shape index: {}]   ;;  %s1032_s4 = inlined_call_operand.vmem [shape: f32[1,128], index: 4, kind: input, shape index: {}]   ;;  %s1033_s5 = inlined_call_operand.hbm [shape: bf16[128,128], index: 5, kind: input, shape index: {}]   ;;  %s1034_s6 = inlined_call_operand.hbm [shape: bf16[128,128], index: 6, kind: input, shape index: {}]   ;;  %s1035_s7 = inlined_call_operand.hbm [shape: bf16[128,128], index: 7, kind: input, shape index: {}]   ;;  %s1036_s8 = inlined_call_operand.vmem [shape: f32[1,128], index: 8, kind: input, shape index: {}]   ;;  %s1037_s9 = inlined_call_operand.vmem [shape: f32[1,128], index: 9, kind: input, shape index: {}]   ;;  %s1038_s10 = inlined_call_operand.vmem [shape: f32[1,128], index: 10, kind: input, shape index: {}]   ;;  %s1039_s11 = inlined_call_operand.hbm [shape: f32[8,128], index: 11, kind: output, shape index: {}]  }
   0x1   :  { %17 = vsyncpa [#allocation6], 0 }
   0x2   :  { %18 = vsyncpa [#allocation9], 0 }
   0x3   :  { %19 = vsyncpa [#allocation12], 0  ;;  %s36_s19 = sshll.u32 %s1029_s1, 4  ;;  %s37_s19 = int_to_ptr.hbm [resolvable:$true] %s36_s19 }
   0x4   :  { %20 = vsyncpa [#allocation4], 0  ;;  %s908_s20 = smov [#allocation5]   ;;  %s66_s24 = sshll.u32 %s1033_s5, 4  ;;  %s67_s24 = int_to_ptr.hbm [resolvable:$true] %s66_s24 }
   0x5   :  { %s38_s21 = sshll.u32 %s908_s20, 4  ;;  %s909_s25 = smov 64   ;;  %s39_s21 = int_to_ptr.vmem [resolvable:$true] %s38_s21 }
   0x6   :  { %s910_s26 = smov 4   ;;  %s911_s27 = smov [#allocation8]  }
   0x7   :  { %44 = dma.hbm_to_vmem [thread:$0]  %s37_s19, 1024, %s39_s21, [#allocation6], %s909_s25, %s909_s25, %s910_s26  }
   0x8   :  { %s68_s28 = sshll.u32 %s911_s27, 4  ;;  %s26_s30 = sshll.u32 %s1028_s0, 4  ;;  %s69_s28 = int_to_ptr.vmem [resolvable:$true] %s68_s28  ;;  %s27_s30 = int_to_ptr.hbm [resolvable:$true] %s26_s30 }
   0x9   :  { %74 = dma.hbm_to_vmem [thread:$0]  %s67_s24, 1024, %s69_s28, [#allocation9], %s909_s25, %s909_s25, %s910_s26  }
   0xa   :  { %s51_s13 = sshll.u32 %s1031_s3, 4  ;;  %s912_s14 = smov [#allocation2]   ;;  %s52_s13 = int_to_ptr.hbm [resolvable:$true] %s51_s13 }
   0xb   :  { %s28_s15 = sshll.u32 %s912_s14, 4  ;;  %s913_s16 = smov [#allocation7]   ;;  %s29_s15 = int_to_ptr.vmem [resolvable:$true] %s28_s15 }
   0xc   :  { %31 = dma.hbm_to_vmem [thread:$0]  %s27_s30, 64, %s29_s15, [#allocation3]  }
   0xd   :  { %s53_s17 = sshll.u32 %s913_s16, 4  ;;  %s79_s0 = sshll.u32 %s1034_s6, 4  ;;  %s54_s17 = int_to_ptr.vmem [resolvable:$true] %s53_s17  ;;  %s80_s0 = int_to_ptr.hbm [resolvable:$true] %s79_s0 }
   0xe   :  { %59 = dma.hbm_to_vmem [thread:$0]  %s52_s13, 1024, %s54_s17, [#allocation6], %s909_s25, %s909_s25, %s910_s26  }
   0xf   :  { %s92_s3 = sshll.u32 %s1035_s7, 4  ;;  %s914_s22 = smov [#allocation10]   ;;  %s93_s3 = int_to_ptr.hbm [resolvable:$true] %s92_s3 }
  0x10   :  { %s81_s23 = sshll.u32 %s914_s22, 4  ;;  %s915_s24 = smov [#allocation11]   ;;  %s82_s23 = int_to_ptr.vmem [resolvable:$true] %s81_s23 }
  0x11   :  { %87 = dma.hbm_to_vmem [thread:$0]  %s80_s0, 1024, %s82_s23, [#allocation9], %s909_s25, %s909_s25, %s910_s26  }
  0x12   :  { %s94_s6 = sshll.u32 %s915_s24, 4  ;;  %s95_s6 = int_to_ptr.vmem [resolvable:$true] %s94_s6 }
  0x13   :  { %100 = dma.hbm_to_vmem [thread:$0]  %s93_s3, 1024, %s95_s6, [#allocation12], %s909_s25, %s909_s25, %s910_s26  }
  0x14   :  { %898 = dma.done.wait [#allocation3], 64  }
  0x15   :  { %899 = vsyncadd [#allocation3], 4294967232 }
  0x16   :  { %900 = dma.done.wait [#allocation6], 2048  }
  0x17   :  { %901 = vsyncadd [#allocation6], 4294965248 }
  0x18   :  { %902 = dma.done.wait [#allocation9], 2048  }
  0x19   :  { %903 = vsyncadd [#allocation9], 4294965248 }
  0x1a   :  { %904 = dma.done.wait [#allocation12], 1024  }
  0x1b   :  { %905 = vsyncadd [#allocation12], 4294966272  ;;  %v593_v0 = vld [vmem:[#allocation5 + $0x38] sm:$0xff]  ;;  %v592_v1 = vld [vmem:[#allocation5 + $0x30] sm:$0xff]  ;;  %s916_s5 = smov [#allocation13]   ;;  %s509_s15 = sshll.u32 %s1039_s11, 4  ;;  %s510_s15 = int_to_ptr.hbm [resolvable:$true] %s509_s15 }
  0x1c   :  { %200 = vmatpush.bf16.msra.mxu0 %v593_v0  ;;  %v601_v2 = vld [vmem:[#allocation7 + $0x38] sm:$0xff]  ;;  %v600_v3 = vld [vmem:[#allocation7 + $0x30] sm:$0xff]  ;;  %v591_v4 = vld [vmem:[#allocation5 + $0x28] sm:$0xff]  ;;  %s507_s12 = sshll.u32 %s916_s5, 4  ;;  %s508_s12 = int_to_ptr.vmem [resolvable:$true] %s507_s12 }
  0x1d   :  { %283 = vmatpush.bf16.msra.mxu1 %v601_v2  ;;  %298 = vmatpush.bf16.msra.mxu2 %v601_v2  ;;  %v599_v5 = vld [vmem:[#allocation7 + $0x28] sm:$0xff]  ;;  %v590_v6 = vld [vmem:[#allocation5 + $0x20] sm:$0xff]  ;;  %v589_v8 = vld [vmem:[#allocation5 + $0x18] sm:$0xff] }
  0x1e   :  { %v598_v7 = vld [vmem:[#allocation7 + $0x20] sm:$0xff]  ;;  %v597_v9 = vld [vmem:[#allocation7 + $0x18] sm:$0xff]  ;;  %v588_v10 = vld [vmem:[#allocation5 + $0x10] sm:$0xff] }
  0x1f   :  { %v596_v11 = vld [vmem:[#allocation7 + $0x10] sm:$0xff]  ;;  %v587_v12 = vld [vmem:[#allocation5 + $0x8] sm:$0xff]  ;;  %v586_v13 = vld [vmem:[#allocation5] sm:$0xff] }
  0x20   :  { %201 = vmatpush.bf16.msra.mxu0 %v592_v1  ;;  %v131_v14 = vld [vmem:[#allocation2] sm:$0xf]  ;;  %v595_v15 = vld [vmem:[#allocation7 + $0x8] sm:$0xff]  ;;  %v594_v16 = vld [vmem:[#allocation7] sm:$0xff] }
  0x21   :  { %284 = vmatpush.bf16.msra.mxu1 %v600_v3  ;;  %299 = vmatpush.bf16.msra.mxu2 %v600_v3  ;;  %v728_v17 = vld [vmem:[%s1030_s2] ss:$0 sm:$0xff]  ;;  %v703_v28 = vld [vmem:[#allocation8 + $0x30] sm:$0xff]   ;;  %v709_v35 = vld [vmem:[#allocation10 + $0x28] sm:$0xff]  }
  0x22   :  { %v704_v23 = vld [vmem:[#allocation8 + $0x38] sm:$0xff]   ;;  %v710_v29 = vld [vmem:[#allocation10 + $0x30] sm:$0xff]   ;;  %v716_v40 = vld [vmem:[#allocation11 + $0x28] sm:$0xff]   ;;  %v628_v43 = vunpack.c.l.bf16 %v703_v28  ;;  %v629_v44 = vunpack.c.h.bf16 %v703_v28  ;;  %v656_v48 = vunpack.c.l.bf16 %v709_v35  ;;  %v657_v49 = vunpack.c.h.bf16 %v709_v35 }
  0x23   :  { %v711_v24 = vld [vmem:[#allocation10 + $0x38] sm:$0xff]   ;;  %v717_v30 = vld [vmem:[#allocation11 + $0x30] sm:$0xff]   ;;  %v632_v31 = vunpack.c.l.bf16 %v704_v23  ;;  %v633_v32 = vunpack.c.h.bf16 %v704_v23  ;;  %v660_v36 = vunpack.c.l.bf16 %v710_v29  ;;  %v661_v37 = vunpack.c.h.bf16 %v710_v29  ;;  %v702_v45 = vld [vmem:[#allocation8 + $0x28] sm:$0xff]  }
  0x24   :  { %202 = vmatpush.bf16.msra.mxu0 %v591_v4  ;;  %v718_v25 = vld [vmem:[#allocation11 + $0x38] sm:$0xff]   ;;  %v664_v26 = vunpack.c.l.bf16 %v711_v24  ;;  %v665_v27 = vunpack.c.h.bf16 %v711_v24  ;;  %v692_v38 = vunpack.c.l.bf16 %v717_v30  ;;  %v693_v39 = vunpack.c.h.bf16 %v717_v30  ;;  %v708_v54 = vld [vmem:[#allocation10 + $0x20] sm:$0xff]   ;;  %v706_v24 = vld [vmem:[#allocation10 + $0x10] sm:$0xff]  }
  0x25   :  { %285 = vmatpush.bf16.msra.mxu1 %v599_v5  ;;  %300 = vmatpush.bf16.msra.mxu2 %v599_v5  ;;  %v696_v33 = vunpack.c.l.bf16 %v718_v25  ;;  %v697_v34 = vunpack.c.h.bf16 %v718_v25  ;;  %v688_v52 = vunpack.c.l.bf16 %v716_v40  ;;  %v689_v53 = vunpack.c.h.bf16 %v716_v40  ;;  %v715_v63 = vld [vmem:[#allocation11 + $0x20] sm:$0xff]   ;;  %v700_v23 = vld [vmem:[#allocation8 + $0x18] sm:$0xff]  }
  0x26   :  { %v403_v46 = vmul.f32 %v692_v38, %v660_v36  ;;  %v404_v47 = vmul.f32 %v693_v39, %v661_v37  ;;  %v624_v57 = vunpack.c.l.bf16 %v702_v45  ;;  %v625_v58 = vunpack.c.h.bf16 %v702_v45  ;;  %v701_v2 = vld [vmem:[#allocation8 + $0x20] sm:$0xff]  }
  0x27   :  { %v405_v41 = vmul.f32 %v696_v33, %v664_v26  ;;  %v406_v42 = vmul.f32 %v697_v34, %v665_v27  ;;  %v401_v61 = vmul.f32 %v688_v52, %v656_v48  ;;  %v402_v62 = vmul.f32 %v689_v53, %v657_v49  ;;  %v699_v33 = vld [vmem:[#allocation8 + $0x10] sm:$0xff]   ;;  %v712_v52 = vld [vmem:[#allocation11 + $0x8] sm:$0xff]  }
  0x28   :  { %203 = vmatpush.bf16.msra.mxu0 %v590_v6  ;;  %v419_v55 = vpack.c.bf16 %v403_v46, %v403_v46  ;;  %v420_v56 = vpack.c.bf16 %v404_v47, %v404_v47  ;;  %v652_v3 = vunpack.c.l.bf16 %v708_v54  ;;  %v653_v4 = vunpack.c.h.bf16 %v708_v54  ;;  %v713_v34 = vld [vmem:[#allocation11 + $0x10] sm:$0xff]  }
  0x29   :  { %286 = vmatpush.bf16.msra.mxu1 %v598_v7  ;;  %301 = vmatpush.bf16.msra.mxu2 %v598_v7  ;;  %v421_v50 = vpack.c.bf16 %v405_v41, %v405_v41  ;;  %v422_v51 = vpack.c.bf16 %v406_v42, %v406_v42  ;;  %v417_v7 = vpack.c.bf16 %v401_v61, %v401_v61  ;;  %v616_v36 = vunpack.c.l.bf16 %v700_v23 }
  0x2a   :  { %v451_v0 = vunpack.c.l.bf16 %v419_v55  ;;  %v452_v1 = vunpack.c.l.bf16 %v420_v56  ;;  %v617_v37 = vunpack.c.h.bf16 %v700_v23  ;;  %v644_v38 = vunpack.c.l.bf16 %v706_v24 }
  0x2b   :  { %v453_v59 = vunpack.c.l.bf16 %v421_v50  ;;  %v454_v60 = vunpack.c.l.bf16 %v422_v51  ;;  %v645_v45 = vunpack.c.h.bf16 %v706_v24  ;;  %v676_v46 = vunpack.c.l.bf16 %v713_v34 }
  0x2c   :  { %204 = vmatpush.bf16.msra.mxu0 %v589_v8  ;;  %v418_v8 = vpack.c.bf16 %v402_v62, %v402_v62  ;;  %v677_v47 = vunpack.c.h.bf16 %v713_v34  ;;  %v613_v53 = vunpack.c.h.bf16 %v699_v33 }
  0x2d   :  { %287 = vmatpush.bf16.msra.mxu1 %v597_v9  ;;  %302 = vmatpush.bf16.msra.mxu2 %v597_v9  ;;  %v469_v5 = vadd.f32 %v632_v31, %v453_v59  ;;  %v470_v6 = vadd.f32 %v633_v32, %v454_v60  ;;  %v467_v9 = vadd.f32 %v628_v43, %v451_v0  ;;  %v705_v43 = vld [vmem:[#allocation10 + $0x8] sm:$0xff]  }
  0x2e   :  { %v395_v54 = vmul.f32 %v676_v46, %v644_v38  ;;  %v396_v55 = vmul.f32 %v677_v47, %v645_v45  ;;  %v640_v56 = vunpack.c.l.bf16 %v705_v43  ;;  %v641_v61 = vunpack.c.h.bf16 %v705_v43  ;;  %v698_v0 = vld [vmem:[#allocation8 + $0x8] sm:$0xff]  }
  0x30   :  { %205 = vmatpush.bf16.msra.mxu0 %v588_v10  ;;  %v468_v10 = vadd.f32 %v629_v44, %v452_v1  ;;  %v612_v44 = vunpack.c.l.bf16 %v699_v33  ;;  %v411_v62 = vpack.c.bf16 %v395_v54, %v395_v54  ;;  %v672_v1 = vunpack.c.l.bf16 %v712_v52 }
  0x31   :  { %288 = vmatpush.bf16.msra.mxu1 %v596_v11  ;;  %303 = vmatpush.bf16.msra.mxu2 %v596_v11  ;;  %v684_v11 = vunpack.c.l.bf16 %v715_v63 }
  0x34   :  { %206 = vmatpush.bf16.msra.mxu0 %v587_v12  ;;  %v685_v12 = vunpack.c.h.bf16 %v715_v63  ;;  %v412_v63 = vpack.c.bf16 %v396_v55, %v396_v55 }
  0x35   :  { %289 = vmatpush.bf16.msra.mxu1 %v595_v15  ;;  %304 = vmatpush.bf16.msra.mxu2 %v595_v15  ;;  %v449_v15 = vunpack.c.l.bf16 %v417_v7 }
  0x36   :  { %v444_v7 = vunpack.c.l.bf16 %v412_v63 }
  0x37   :  { %v465_v25 = vadd.f32 %v624_v57, %v449_v15  ;;  %v729_v57 = vld [vmem:[%s1032_s4] ss:$0 sm:$0xff] }
  0x38   :  { %207 = vmatpush.bf16.msra.mxu0 %v586_v13  ;;  %v707_v13 = vld [vmem:[#allocation10 + $0x18] sm:$0xff]   ;;  %v460_v15 = vadd.f32 %v613_v53, %v444_v7 }
  0x39   :  { %290 = vmatpush.bf16.msra.mxu1 %v594_v16  ;;  %305 = vmatpush.bf16.msra.mxu2 %v594_v16  ;;  %v450_v16 = vunpack.c.l.bf16 %v418_v8  ;;  %v648_v27 = vunpack.c.l.bf16 %v707_v13  ;;  %v649_v28 = vunpack.c.h.bf16 %v707_v13  ;;  %v393_v8 = vmul.f32 %v672_v1, %v640_v56 }
  0x3a   :  { %v609_v13 = vunpack.c.h.bf16 %v698_v0 }
  0x3b   :  { %208 = vmatmul.bf16.vlgmr.msra.gmra.mxu0 %v131_v14  ;;  %v478_v14 = vpack.c.bf16 %v470_v6, %v469_v5  ;;  %v466_v26 = vadd.f32 %v625_v58, %v450_v16  ;;  %v443_v6 = vunpack.c.l.bf16 %v411_v62  ;;  %v409_v16 = vpack.c.bf16 %v393_v8, %v393_v8 }
  0x3d   :  { %488 = vmatpush.bf16.msra.mxu3 %v478_v14  ;;  %v476_v35 = vpack.c.bf16 %v466_v26, %v465_v25  ;;  %v459_v14 = vadd.f32 %v612_v44, %v443_v6 }
  0xb8   :  { %v209_v18 = vpop.f32.mrf.mxu0 }
  0xb9   :  { %v210_v19 = vadd.f32 %v728_v17, %v209_v18  ;;  %v620_v17 = vunpack.c.l.bf16 %v701_v2  ;;  %v714_v18 = vld [vmem:[#allocation11 + $0x18] sm:$0xff]  }
  0xba   :  { %v680_v31 = vunpack.c.l.bf16 %v714_v18  ;;  %v681_v32 = vunpack.c.h.bf16 %v714_v18 }
  0xbb   :  { %v230_v20 = vmax.f32 %v210_v19, 0.0  ;;  %v477_v19 = vpack.c.bf16 %v468_v10, %v467_v9 }
  0xbc   :  { %v397_v41 = vmul.f32 %v680_v31, %v648_v27  ;;  %v398_v42 = vmul.f32 %v681_v32, %v649_v28  ;;  %v635_v27 = vld [vmem:[#allocation10] sm:$0xff]  }
  0xbd   :  { %v231_v21 = vpack.c.bf16 %v230_v20, %v230_v20  ;;  %v621_v20 = vunpack.c.h.bf16 %v701_v2  ;;  %489 = vmatpush.bf16.msra.mxu3 %v477_v19  ;;  %v673_v2 = vunpack.c.h.bf16 %v712_v52  ;;  %v441_v19 = vunpack.c.l.bf16 %v409_v16  ;;  %v667_v28 = vld [vmem:[#allocation11] sm:$0xff]   ;;  %v479_v52 = vld [vmem:[%s1036_s8] sm:$0x1] }
  0xbe   :  { %v413_v50 = vpack.c.bf16 %v397_v41, %v397_v41  ;;  %v414_v51 = vpack.c.bf16 %v398_v42, %v398_v42  ;;  %v668_v31 = vunpack.c.l.bf16 %v667_v28  ;;  %v669_v32 = vunpack.c.h.bf16 %v667_v28 }
  0xbf   :  { %291 = vmatmul.bf16.vlgmr.msra.gmra.mxu1 %v231_v21  ;;  %v399_v21 = vmul.f32 %v684_v11, %v652_v3  ;;  %v394_v9 = vmul.f32 %v673_v2, %v641_v61 }
  0xc0   :  { %v211_v22 = vpop.f32.mrf.mxu0  ;;  %v445_v59 = vunpack.c.l.bf16 %v413_v50  ;;  %v446_v60 = vunpack.c.l.bf16 %v414_v51  ;;  %v481_v50 = vld [vmem:[%s1038_s10] sm:$0x1] }
  0xc1   :  { %v400_v22 = vmul.f32 %v685_v12, %v653_v4  ;;  %v415_v29 = vpack.c.bf16 %v399_v21, %v399_v21  ;;  %490 = vmatpush.bf16.msra.mxu3 %v476_v35  ;;  %v608_v12 = vunpack.c.l.bf16 %v698_v0 }
  0xc2   :  { %v461_v3 = vadd.f32 %v616_v36, %v445_v59  ;;  %v462_v4 = vadd.f32 %v617_v37, %v446_v60  ;;  %v603_v37 = vld [vmem:[#allocation8] sm:$0xff]  }
  0xc3   :  { %v416_v30 = vpack.c.bf16 %v400_v22, %v400_v22  ;;  %v447_v39 = vunpack.c.l.bf16 %v415_v29  ;;  %v473_v22 = vpack.c.bf16 %v460_v15, %v459_v14  ;;  %v457_v23 = vadd.f32 %v608_v12, %v441_v19 }
  0xc4   :  { %v474_v11 = vpack.c.bf16 %v462_v4, %v461_v3  ;;  %v636_v29 = vunpack.c.l.bf16 %v635_v27  ;;  %v604_v38 = vunpack.c.l.bf16 %v603_v37 }
  0xc5   :  { %v448_v40 = vunpack.c.l.bf16 %v416_v30  ;;  %v463_v48 = vadd.f32 %v620_v17, %v447_v39  ;;  %v410_v17 = vpack.c.bf16 %v394_v9, %v394_v9  ;;  %v637_v30 = vunpack.c.h.bf16 %v635_v27 }
  0xc6   :  { %v391_v33 = vmul.f32 %v668_v31, %v636_v29  ;;  %v605_v39 = vunpack.c.h.bf16 %v603_v37 }
  0xc7   :  { %v464_v49 = vadd.f32 %v621_v20, %v448_v40  ;;  %v442_v20 = vunpack.c.l.bf16 %v410_v17  ;;  %v392_v34 = vmul.f32 %v669_v32, %v637_v30 }
  0xc8   :  { %v407_v35 = vpack.c.bf16 %v391_v33, %v391_v33 }
  0xc9   :  { %v475_v58 = vpack.c.bf16 %v464_v49, %v463_v48  ;;  %v458_v24 = vadd.f32 %v609_v13, %v442_v20  ;;  %v408_v36 = vpack.c.bf16 %v392_v34, %v392_v34  ;;  %v480_v49 = vld [vmem:[%s1037_s9] sm:$0x1] }
  0xca   :  { %v439_v40 = vunpack.c.l.bf16 %v407_v35  ;;  %v482_v51 = vmul.f32 %v481_v50, %v480_v49 }
  0xcb   :  { %491 = vmatpush.bf16.msra.mxu3 %v475_v58  ;;  %v472_v26 = vpack.c.bf16 %v458_v24, %v457_v23  ;;  %v440_v41 = vunpack.c.l.bf16 %v408_v36 }
  0xcc   :  { %v455_v42 = vadd.f32 %v604_v38, %v439_v40  ;;  %v483_v53 = vadd.f32 %v482_v51, %v479_v52 }
  0xcd   :  { %v456_v43 = vadd.f32 %v605_v39, %v440_v41 }
  0xce   :  { %v486_v54 = vperm.slane %v483_v53, 0 }
  0xcf   :  { %492 = vmatpush.bf16.msra.mxu3 %v474_v11  ;;  %v471_v44 = vpack.c.bf16 %v456_v43, %v455_v42 }
  0xd3   :  { %493 = vmatpush.bf16.msra.mxu3 %v473_v22 }
  0xd7   :  { %494 = vmatpush.bf16.msra.mxu3 %v472_v26 }
  0xdb   :  { %495 = vmatpush.bf16.msra.mxu3 %v471_v44 }
 0x13c   :  { %v292_v5 = vpop.f32.mrf.mxu1 }
 0x13d   :  { %v293_v10 = vadd.f32 %v729_v57, %v292_v5 }
 0x13f   :  { %v296_v18 = vmax.f32 %v293_v10, 0.0 }
 0x141   :  { %v297_v21 = vpack.c.bf16 %v296_v18, %v296_v18 }
 0x143   :  { %306 = vmatmul.bf16.vlgmr.msra.gmra.mxu2 %v297_v21 }
 0x144   :  { %v294_v25 = vpop.f32.mrf.mxu1 }
 0x1c6   :  { %v307_v45 = vpop.f32.mrf.mxu2 }
 0x1c7   :  { %v308_v46 = vadd.f32 %v729_v57, %v307_v45 }
 0x1c9   :  { %v484_v47 = vpack.c.bf16 %v308_v46, %v308_v46 }
 0x1cb   :  { %496 = vmatmul.bf16.vlgmr.msra.gmra.mxu3 %v484_v47 }
 0x1ce   :  { %v309_v48 = vpop.f32.mrf.mxu2 }
 0x24e   :  { %v497_v55 = vpop.f32.mrf.mxu3 }
 0x24f   :  { %v498_v56 = vadd.f32 %v497_v55, %v486_v54 }
 0x251   :  { %501 = vst [vmem:[#allocation13] sm:$0xff] %v498_v56 }
 0x252   :  { %512 = dma.vmem_to_hbm [thread:$0]  %s508_s12, 128, %s510_s15, [#allocation4]  }
 0x256   :  { %v499_v57 = vpop.f32.mrf.mxu3 }
 0x257   :  { %906 = dma.done.wait [#allocation4], 128  }
 0x258   :  { %907 = vsyncadd [#allocation4], 4294967168 }
 0x259   :  { %517 = vsyncpa [#allocation3], 1 }
 0x25a   :  { %518 = vsyncpa [#allocation6], 1 }
 0x25b   :  { %519 = vsyncpa [#allocation9], 1 }
 0x25c   :  { %520 = vsyncpa [#allocation12], 1 }
 0x25d   :  { %521 = vsyncpa [#allocation4], 1 }

</bundles_post_ra>
